<compile_context>
chip_gen: v7x
topology: tpu7x:2x2x1
jax: 0.10.0
libtpu: 0.0.40
codegen_flags: <defaults>
</compile_context>

<pallas_src>
import math

import jax
import jax.numpy as jnp
from jax.experimental import pallas as pl
from jax.experimental.pallas import tpu as pltpu


def _round_up(x, m):
    return (x + m - 1) // m * m


def _make_kernel(HW, THW, need_mask):
    """Build the grid-step kernel (HW / THW baked in as static constants)."""

    def kernel(x_ref, w_ref, b_ref, o_ref, acc_ref):
        # x_ref:   (TB, C, THW) native dtype — streamed activation tile
        # w_ref:   (C, O_pad)   f32          — resident, pre-scaled by 1/HW
        # b_ref:   (1, O_pad)   f32          — resident
        # o_ref:   (TB, O_pad)  f32          — resident across reduction axis
        # acc_ref: (TB, C)      f32          — pooled-sum accumulator (scratch)
        k = pl.program_id(1)

        @pl.when(k == 0)
        def _init():
            acc_ref[...] = jnp.zeros_like(acc_ref)

        x = x_ref[...]
        if need_mask:
            # Only the tail spatial tile has invalid lanes; for earlier tiles
            # the predicate is all-true (select is hidden under the HBM stream).
            col = jax.lax.broadcasted_iota(jnp.int32, x.shape, dimension=2)
            x = jnp.where(col + k * THW < HW, x, jnp.zeros_like(x))

        # Partial global-average-pool: lane-axis reduce with the upcast fused
        # into the reduction (no materialized f32 copy of the tile).
        acc_ref[...] += jnp.sum(x, axis=-1, dtype=jnp.float32)

        @pl.when(k == pl.num_programs(1) - 1)
        def _finalize():
            # 1/HW is folded into w_ref; weight/bias padded to lane-dense O_pad.
            o_ref[...] = (
                jnp.dot(acc_ref[...], w_ref[...], preferred_element_type=jnp.float32)
                + b_ref[...]
            )

    return kernel


def _vmem_budget():
    """Generation-aware per-activation-buffer budget and scoped-VMEM limit."""
    try:
        cap = pltpu.get_tpu_info().vmem_capacity_bytes
    except Exception:
        cap = 64 * 1024 * 1024  # conservative (v7x-sized) fallback
    # v7x (64 MiB): ~8 MiB/buffer; v5e/v6e (128 MiB): 12 MiB/buffer.
    act_budget = max(4 * 1024 * 1024, min(12 * 1024 * 1024, cap // 8))
    # Explicit limit (v5e's scoped default is only 16 MiB); keep headroom.
    vmem_limit = min(48 * 1024 * 1024, (cap * 3) // 4)
    return act_budget, vmem_limit


def _pick_tiles(B, C, HW, bytes_per_elem, budget):
    """Pick (batch_tile, spatial_tile)."""
    if B >= 16:
        # Guarantee >= 2 "parallel" batch blocks so both v7x TensorCores work.
        tb = min(128, max(8, _round_up(pl.cdiv(B, 2), 8)))
    else:
        # Small batch: one exact tile (block dim == full array dim, no padding).
        tb = B

    # Shrink the batch tile if even a 128-lane slab would blow the budget.
    while tb > 8 and tb * C * 128 * bytes_per_elem > budget:
        tb = max(8, _round_up(tb // 2, 8))

    # Spatial tile: as large as the budget allows, lane-dense multiple of 128.
    max_thw = max(128, (budget // max(1, tb * C * bytes_per_elem)) // 128 * 128)
    thw = min(_round_up(HW, 128), max_thw)
    return tb, thw


def ffdecoder_forward(x_nchw, weight, bias):
    """AdaptiveAvgPool2d((1,1)) -> flatten -> Linear.

    x_nchw: (B, C, H, W); weight: (O, C) in nn.Linear layout; bias: (O,).
    """
    B, C, H, W = x_nchw.shape
    HW = H * W
    O = weight.shape[0]

    bpe = jnp.dtype(x_nchw.dtype).itemsize
    budget, vmem_limit = _vmem_budget()
    TB, THW = _pick_tiles(B, C, HW, bpe, budget)

    nb = pl.cdiv(B, TB)
    nk = pl.cdiv(HW, THW)
    B_pad = nb * TB                  # output rows (padded rows sliced off below)
    O_pad = _round_up(O, 128)        # lane-dense output slab (no masked vst)
    need_mask = (HW % THW) != 0      # tail spatial tile must be masked in-kernel

    # Trivial metadata reshape (merges contiguous trailing dims) — no HBM pass,
    # no dtype cast, no padding: x streams straight from its producer layout.
    x3 = x_nchw.reshape(B, C, HW)

    # Fold the 1/HW pooling normalization into the resident FC weight; pad the
    # tiny output dim with zero columns (sliced off after the kernel).
    w_t = jnp.transpose(weight).astype(jnp.float32) / float(HW)
    w_t = jnp.pad(w_t, ((0, 0), (0, O_pad - O)))
    b2d = jnp.pad(bias.astype(jnp.float32), (0, O_pad - O)).reshape(1, O_pad)

    cost = pl.CostEstimate(
        flops=2 * B * C * HW + 2 * B_pad * C * O_pad,
        transcendentals=0,
        bytes_accessed=B * C * HW * bpe + (C + 1 + B_pad) * O_pad * 4,
    )

    out_padded = pl.pallas_call(
        _make_kernel(HW, THW, need_mask),
        out_shape=jax.ShapeDtypeStruct((B_pad, O_pad), jnp.float32),
        grid_spec=pltpu.PrefetchScalarGridSpec(
            num_scalar_prefetch=0,
            grid=(nb, nk),
            in_specs=[
                # Streamed activation tiles (double-buffered by Pallas).
                pl.BlockSpec((TB, C, THW), lambda i, k: (i, 0, k)),
                # Weight / bias: constant index_map => DMA'd once, VMEM-resident.
                pl.BlockSpec((C, O_pad), lambda i, k: (0, 0)),
                pl.BlockSpec((1, O_pad), lambda i, k: (0, 0)),
            ],
            out_specs=pl.BlockSpec((TB, O_pad), lambda i, k: (i, 0)),
            scratch_shapes=[pltpu.VMEM((TB, C), jnp.float32)],
        ),
        compiler_params=pltpu.CompilerParams(
            dimension_semantics=("parallel", "arbitrary"),
            vmem_limit_bytes=vmem_limit,
        ),
        cost_estimate=cost,
    )(x3, w_t, b2d)

    return out_padded[:B, :O].astype(x_nchw.dtype)


if __name__ == "__main__":
    # Small shapes consistent with the module: in_dim = (C, H, W), out_dim = O.
    B, C, H, W = 2, 4, 16, 16
    O = 8

    key = jax.random.PRNGKey(0)
    kx, kw, kb = jax.random.split(key, 3)

    x = jax.random.normal(kx, (B, C, H, W), dtype=jnp.float32)

    # Deterministic nn.Linear-style init: U(-1/sqrt(in_dim), 1/sqrt(in_dim)).
    bound = 1.0 / math.sqrt(C)
    weight = jax.random.uniform(kw, (O, C), minval=-bound, maxval=bound,
                                dtype=jnp.float32)
    bias = jax.random.uniform(kb, (O,), minval=-bound, maxval=bound,
                              dtype=jnp.float32)

    fwd = jax.jit(ffdecoder_forward)
    out = jax.block_until_ready(fwd(x, weight, bias))

    # Pure-JAX f32 reference of the PyTorch forward. The kernel now streams
    # activations in native f32, so the tolerance is tight.
    ref = jnp.mean(x, axis=(2, 3)) @ weight.T + bias
    assert out.shape == (B, O)
    assert jnp.allclose(out, ref, atol=1e-4, rtol=1e-4), "mismatch vs reference"

    print("KERNEL_OK")
</pallas_src>

<mosaic_0001>
module attributes {stable_mosaic.version = 11 : i64} {
  func.func @kernel(%arg0: i32, %arg1: i32, %arg2: memref<2x4x256xf32, #tpu.memory_space<vmem>>, %arg3: memref<4x128xf32, #tpu.memory_space<vmem>>, %arg4: memref<1x128xf32, #tpu.memory_space<vmem>>, %arg5: memref<2x128xf32, #tpu.memory_space<vmem>>, %arg6: memref<2x4xf32, #tpu.memory_space<vmem>>) attributes {dimension_semantics = [#tpu.dimension_semantics<parallel>, #tpu.dimension_semantics<arbitrary>], iteration_bounds = array<i64: 1, 1>, scalar_prefetch = 0 : i64, scratch_operands = 1 : i64, tpu.core_type = #tpu.core_type<tc>, window_params = [{transform_indices = @transform_0, window_bounds = array<i64: 2, 4, 256>}, {pipeline_mode = #tpu.pipeline_mode<synchronous>, transform_indices = @transform_1, window_bounds = array<i64: 4, 128>}, {pipeline_mode = #tpu.pipeline_mode<synchronous>, transform_indices = @transform_2, window_bounds = array<i64: 1, 128>}, {transform_indices = @transform_3, window_bounds = array<i64: 2, 128>}]} {
    %c0_i32 = arith.constant 0 : i32
    %0 = arith.cmpi eq, %arg1, %c0_i32 : i32
    %1 = arith.extui %0 : i1 to i32
    %c0_i32_0 = arith.constant 0 : i32
    %2 = arith.cmpi ne, %1, %c0_i32_0 : i32
    scf.if %2 {
      %cst_9 = arith.constant 0.000000e+00 : f32
      %11 = vector.broadcast %cst_9 : f32 to vector<2x4xf32>
      %c0_10 = arith.constant 0 : index
      %c0_11 = arith.constant 0 : index
      %12 = vector.load %arg6[%c0_10, %c0_11] : memref<2x4xf32, #tpu.memory_space<vmem>>, vector<2x4xf32>
      tpu.vector_store %arg6[%c0_10, %c0_11], %11 {strides = array<i32>} : memref<2x4xf32, #tpu.memory_space<vmem>>, vector<2x4xf32>,
    } else {
    }
    %c0 = arith.constant 0 : index
    %c0_1 = arith.constant 0 : index
    %c0_2 = arith.constant 0 : index
    %3 = vector.load %arg2[%c0, %c0_1, %c0_2] : memref<2x4x256xf32, #tpu.memory_space<vmem>>, vector<2x4x256xf32>
    %c0_3 = arith.constant 0 : index
    %c0_4 = arith.constant 0 : index
    %4 = vector.load %arg6[%c0_3, %c0_4] : memref<2x4xf32, #tpu.memory_space<vmem>>, vector<2x4xf32>
    %cst = arith.constant dense<0.000000e+00> : vector<2x4xf32>
    %5 = vector.multi_reduction <add>, %3, %cst [2] : vector<2x4x256xf32> to vector<2x4xf32>
    %6 = arith.addf %4, %5 : vector<2x4xf32>
    %c0_5 = arith.constant 0 : index
    %c0_6 = arith.constant 0 : index
    %7 = vector.load %arg6[%c0_5, %c0_6] : memref<2x4xf32, #tpu.memory_space<vmem>>, vector<2x4xf32>
    tpu.vector_store %arg6[%c0_5, %c0_6], %6 {strides = array<i32>} : memref<2x4xf32, #tpu.memory_space<vmem>>, vector<2x4xf32>,
    %c0_i32_7 = arith.constant 0 : i32
    %8 = arith.cmpi eq, %arg1, %c0_i32_7 : i32
    %9 = arith.extui %8 : i1 to i32
    %c0_i32_8 = arith.constant 0 : i32
    %10 = arith.cmpi ne, %9, %c0_i32_8 : i32
    scf.if %10 {
      %c0_9 = arith.constant 0 : index
      %c0_10 = arith.constant 0 : index
      %11 = vector.load %arg6[%c0_9, %c0_10] : memref<2x4xf32, #tpu.memory_space<vmem>>, vector<2x4xf32>
      %c0_11 = arith.constant 0 : index
      %c0_12 = arith.constant 0 : index
      %12 = vector.load %arg3[%c0_11, %c0_12] : memref<4x128xf32, #tpu.memory_space<vmem>>, vector<4x128xf32>
      %cst_13 = arith.constant dense<0.000000e+00> : vector<2x128xf32>
      %13 = tpu.matmul %11, %12, %cst_13 {dimension_numbers = #tpu.dot_dimension_numbers<[1], [0], [0], [1], [0, 0, 1, 1], [], []>} : vector<2x4xf32>, vector<4x128xf32>, vector<2x128xf32> -> vector<2x128xf32>
      %c0_14 = arith.constant 0 : index
      %c0_15 = arith.constant 0 : index
      %14 = vector.load %arg4[%c0_14, %c0_15] : memref<1x128xf32, #tpu.memory_space<vmem>>, vector<1x128xf32>
      %15 = vector.broadcast %14 : vector<1x128xf32> to vector<2x128xf32>
      %16 = arith.addf %13, %15 : vector<2x128xf32>
      %c0_16 = arith.constant 0 : index
      %c0_17 = arith.constant 0 : index
      %17 = vector.load %arg5[%c0_16, %c0_17] : memref<2x128xf32, #tpu.memory_space<vmem>>, vector<2x128xf32>
      tpu.vector_store %arg5[%c0_16, %c0_17], %16 {strides = array<i32>} : memref<2x128xf32, #tpu.memory_space<vmem>>, vector<2x128xf32>,
    } else {
    }
    return
  }
  func.func @transform_0(%arg0: i32, %arg1: i32) -> (i32, i32, i32) {
    %c0_i32 = arith.constant 0 : i32
    %c0_i32_0 = arith.constant 0 : i32
    return %arg0, %c0_i32, %arg1 : i32, i32, i32
  }
  func.func @transform_1(%arg0: i32, %arg1: i32) -> (i32, i32) {
    %c0_i32 = arith.constant 0 : i32
    %c0_i32_0 = arith.constant 0 : i32
    %c0_i32_1 = arith.constant 0 : i32
    return %c0_i32, %c0_i32_0 : i32, i32
  }
  func.func @transform_2(%arg0: i32, %arg1: i32) -> (i32, i32) {
    %c0_i32 = arith.constant 0 : i32
    %c0_i32_0 = arith.constant 0 : i32
    %c0_i32_1 = arith.constant 0 : i32
    return %c0_i32, %c0_i32_0 : i32, i32
  }
  func.func @transform_3(%arg0: i32, %arg1: i32) -> (i32, i32) {
    %c0_i32 = arith.constant 0 : i32
    %c0_i32_0 = arith.constant 0 : i32
    return %arg0, %c0_i32 : i32, i32
  }
}

</mosaic_0001>

<bundles_post_ra>
// kernel: ffdecoder_forward.1
= control target key start
LH: loop header
LB: loop body
LE: loop exit
PB: predicated region body
PF: predicated region fallthrough
CT: control target
= control target key end

     0   :  { %vm30_vm0 = vcmask 1043456   ;;  %s256_s0 = inlined_call_operand.vmem [shape: f32[2,4,256], index: 0, kind: input, shape index: {}]   ;;  %s257_s1 = inlined_call_operand.vmem [shape: f32[4,128], index: 1, kind: input, shape index: {}]   ;;  %s258_s2 = inlined_call_operand.vmem [shape: f32[1,128], index: 2, kind: input, shape index: {}]   ;;  %s259_s3 = inlined_call_operand.hbm [shape: f32[2,128], index: 3, kind: output, shape index: {}]  }
   0x1   :  { %v21_v0 = vld [vmem:[%s256_s0] sm:$0xff]  ;;  %v22_v1 = vld [vmem:[%s256_s0 + $0x8] sm:$0xff] }
   0x2   :  { %8 = vsyncpa [#allocation4], 0  ;;  %v26_v2 = vcombine.high %v21_v0, %v21_v0  ;;  %v31_v3 = vsel %vm30_vm0, %v21_v0, 0.0  ;;  %v27_v4 = vcombine.high %v22_v1, %v22_v1  ;;  %v36_v6 = vsel %vm30_vm0, %v22_v1, 0.0  ;;  %v63_v11 = vld [vmem:[%s257_s1] sm:$0xf] }
   0x3   :  { %vm19_vm1 = vcmask 25600   ;;  %v202_v10 = vmov 0.0   ;;  %vm203_vm2 = vmmov 0   ;;  %v43_v12 = vlaneseq  ;;  %v163_v24 = vld [vmem:[%s258_s2] ss:$0 sm:$0xff]  ;;  %s204_s18 = smov [#allocation3]  }
   0x4   :  { %v32_v5 = vsel %vm30_vm0, %v26_v2, 0.0  ;;  %v37_v7 = vsel %vm30_vm0, %v27_v4, 0.0  ;;  %20 = vst.msk [vmem:[#allocation2] sm:$0x3] %vm19_vm1, %v202_v10  ;;  %168 = vmatprep.subr.mxu0 %v202_v10  ;;  %170 = vmatprep.mubr.msk.f32.mxu0 %vm203_vm2, %v202_v10  ;;  %vm53_vm3 = vcmask 1041409   ;;  %vm71_vm4 = vcmask 31744  }
   0x5   :  { %v33_v8 = vadd.f32 %v32_v5, %v31_v3  ;;  %v38_v9 = vadd.f32 %v37_v7, %v36_v6  ;;  %169 = vmatpush3.msk.msra.mxu0 %vm30_vm0, %v63_v11  ;;  %v44_v13 = vand.u32 127, %v43_v12  ;;  %v46_v14 = vshrl.u32 %v43_v12, 7  ;;  %s155_s19 = sshll.u32 %s204_s18, 4  ;;  %s156_s19 = int_to_ptr.vmem [resolvable:$true] %s155_s19 }
   0x6   :  { %s178_s20 = scalar_lea.vmem %s156_s19, 32  ;;  %p183_p1 = scmp.lt.s32.totalorder %s156_s19, %s156_s19 }
   0x7   :  { %34 = vadd.xlane.f32.xlu0 %v33_v8  ;;  %v47_v16 = vsub.s32 %v44_v13, %v46_v14  ;;  %p179_p0 = scmp.ne.s32.totalorder %s156_s19, %s178_s20  ;;  %p184_p2 = scmp.lt.s32.totalorder %s178_s20, %s178_s20 }
   0x9   :  { %p185_p3 = por %p184_p2, %p183_p1 }
   0xb   :  { %39 = vadd.xlane.f32.xlu0 %v38_v9  ;;  %v23_v20 = vld [vmem:[#allocation2] sm:$0x3]  ;;  %p186_p4 = pnand %p185_p3, %p179_p0 }
  0x94   :  { %v35_v15 = vpop.xlane.xlu0 %34 }
  0x95   :  { %v48_v18 = vrot.slane %v35_v15, %v47_v16 }
  0x98   :  { %v40_v17 = vpop.xlane.xlu0 %39 }
  0x99   :  { %v52_v19 = vrot.slane %v40_v17, %v47_v16 }
  0x9b   :  { %v54_v21 = vsel %vm53_vm3, %v52_v19, %v48_v18 }
  0x9c   :  { %v56_v22 = vadd.f32 %v54_v21, %v23_v20 }
  0x9e   :  { %58 = vst.msk [vmem:[#allocation2] sm:$0x3] %vm19_vm1, %v56_v22 }
  0xa5   :  { %v62_v23 = vld [vmem:[#allocation2] sm:$0x3] }
  0xa6   :  { %171 = vmatmul.mubr.msk.f32.vlgmr.msra.gmra.mrb[0].mxu0 %vm71_vm4, %v62_v23 }
 0x179   :  { %v144_v25 = vpop.f32.mrb[0].mxu0 }
 0x17a   :  { %v145_v26 = vadd.f32 %v163_v24, %v144_v25  ;;  %v172_v27 = vpop.f32.mrb[1].mxu0 }
 0x17c   :  { %148 = vst [vmem:[#allocation3] sm:$0x3] %v145_v26 }
 0x17d   :  { %189 = shalt.err (!%p186_p4)
}
 0x17e   :  { %s190_s23 = scalar_lea.hbm %s259_s3, 32 }
 0x17f   :  { %p191_p5 = scmp.ne.s32.totalorder %s259_s3, %s190_s23  ;;  %p194_p6 = scmp.lt.u32.totalorder %s190_s23, %s259_s3 }
 0x181   :  { %p196_p7 = pnand %p194_p6, %p191_p5 }
 0x183   :  { %199 = shalt.err (!%p196_p7)
}
 0x184   :  { %158 = dma.vmem_to_hbm [thread:$0]  %s156_s19, 32, %s259_s3, [#allocation4]  }
 0x185   :  { %200 = dma.done.wait [#allocation4], 32  }
 0x186   :  { %201 = vsyncadd [#allocation4], 4294967264 }
 0x187   :  { %162 = vsyncpa [#allocation4], 1 }

</bundles_post_ra>
